<compile_context>
chip_gen: v5e
topology: v5e:2x2
jax: 0.10.0
libtpu: 0.0.40
codegen_flags: <defaults>
</compile_context>

<pallas_src>
import jax
import jax.numpy as jnp
from jax.experimental import pallas as pl
from jax.experimental.pallas import tpu as pltpu

IN_DIM = 600    # layer-1 fan-in
HID_DIM = 200   # layer-1 fan-out / layer-2 fan-in
OUT_DIM = 1     # layer-2 fan-out
HID_PAD = 256   # hidden padded to a multiple of 128 lanes (zero cols => exact)
OUT_PAD = 128   # output padded so stores are full-lane (unmasked) vst


def _dist_projector_kernel(x_ref, w1_ref, b1_ref, w2_ref, b2_ref, o_ref):
    # relu(x @ W1 + b1) @ W2 + b2 on one (TB, IN_DIM) tile of rows.
    h = jnp.dot(x_ref[...], w1_ref[...], preferred_element_type=jnp.float32)
    h = jnp.maximum(h + b1_ref[...], 0.0)                 # (TB, HID_PAD) f32
    y = jnp.dot(h.astype(w2_ref.dtype), w2_ref[...],
                preferred_element_type=jnp.float32)       # (TB, OUT_PAD) f32
    o_ref[...] = (y + b2_ref[...]).astype(o_ref.dtype)


def _round_up(n, m):
    return ((n + m - 1) // m) * m


def dist_projector(x, w1, b1, w2, b2, *, compute_dtype=jnp.bfloat16, tb=1024):
    """x: [B, 600] -> [B, 1].

    w1: [600, 200], b1: [200], w2: [200, 1], b2: [1]  (W stored as [in, out]).
    """
    B = x.shape[0]
    assert x.shape == (B, IN_DIM), x.shape

    # ---- weight / bias packing (tiny, zero-padded => math is exact) ----------
    # Padded hidden cols: bias 0, relu(0)=0, and the matching w2 rows are 0.
    # Padded output cols: w2 cols and b2 are 0, and they are sliced off below.
    w1p = jnp.zeros((IN_DIM, HID_PAD), compute_dtype).at[:, :HID_DIM].set(
        w1.astype(compute_dtype))
    b1p = jnp.zeros((1, HID_PAD), jnp.float32).at[:, :HID_DIM].set(
        b1.reshape(1, HID_DIM).astype(jnp.float32))
    w2p = jnp.zeros((HID_PAD, OUT_PAD), compute_dtype).at[:HID_DIM, :OUT_DIM].set(
        w2.astype(compute_dtype))
    b2p = jnp.zeros((1, OUT_PAD), jnp.float32).at[:, :OUT_DIM].set(
        b2.reshape(1, OUT_DIM).astype(jnp.float32))

    # ---- batch tiling ---------------------------------------------------------
    tb_eff = min(_round_up(tb, 8), _round_up(max(B, 1), 8))
    b_pad = _round_up(B, tb_eff)

    xq = x.astype(compute_dtype)
    if b_pad != B:
        xq = jnp.pad(xq, ((0, b_pad - B), (0, 0)))  # zero rows, sliced off below

    grid = (b_pad // tb_eff,)

    itemsize = jnp.dtype(compute_dtype).itemsize
    cost = pl.CostEstimate(
        flops=2 * B * (IN_DIM * HID_DIM + HID_DIM * OUT_DIM),
        transcendentals=0,
        bytes_accessed=(B * IN_DIM * itemsize
                        + (IN_DIM * HID_PAD + HID_PAD * OUT_PAD) * itemsize
                        + (HID_PAD + OUT_PAD) * 4
                        + B * OUT_PAD * 4),
    )

    out = pl.pallas_call(
        _dist_projector_kernel,
        out_shape=jax.ShapeDtypeStruct((b_pad, OUT_PAD), jnp.float32),
        grid_spec=pltpu.PrefetchScalarGridSpec(
            num_scalar_prefetch=0,
            grid=grid,
            in_specs=[
                pl.BlockSpec((tb_eff, IN_DIM), lambda i: (i, 0)),    # x: row tiles
                pl.BlockSpec((IN_DIM, HID_PAD), lambda i: (0, 0)),   # weights stay
                pl.BlockSpec((1, HID_PAD), lambda i: (0, 0)),        #   VMEM-resident
                pl.BlockSpec((HID_PAD, OUT_PAD), lambda i: (0, 0)),
                pl.BlockSpec((1, OUT_PAD), lambda i: (0, 0)),
            ],
            out_specs=pl.BlockSpec((tb_eff, OUT_PAD), lambda i: (i, 0)),
        ),
        compiler_params=pltpu.CompilerParams(
            # Row tiles are independent -> shardable across both TCs on v7x.
            dimension_semantics=("parallel",),
        ),
        cost_estimate=cost,
    )(xq, w1p, b1p, w2p, b2p)

    return out[:B, :OUT_DIM].astype(x.dtype)


def init_params(key):
    """Deterministic init mimicking nn.Linear's uniform(-1/sqrt(fan_in), +)."""
    k1, k2, k3, k4 = jax.random.split(key, 4)
    lim1 = 1.0 / jnp.sqrt(jnp.float32(IN_DIM))
    lim2 = 1.0 / jnp.sqrt(jnp.float32(HID_DIM))
    w1 = jax.random.uniform(k1, (IN_DIM, HID_DIM), jnp.float32, -lim1, lim1)
    b1 = jax.random.uniform(k2, (HID_DIM,), jnp.float32, -lim1, lim1)
    w2 = jax.random.uniform(k3, (HID_DIM, OUT_DIM), jnp.float32, -lim2, lim2)
    b2 = jax.random.uniform(k4, (OUT_DIM,), jnp.float32, -lim2, lim2)
    return w1, b1, w2, b2


def reference(x, w1, b1, w2, b2):
    h = jnp.maximum(x @ w1 + b1.reshape(1, -1), 0.0)
    return h @ w2 + b2.reshape(1, -1)


if __name__ == "__main__":
    key = jax.random.PRNGKey(0)
    kx, kp = jax.random.split(key)
    w1, b1, w2, b2 = init_params(kp)

    # Small single-tile smoke test.
    B = 8
    x = jax.random.normal(kx, (B, IN_DIM), jnp.float32)
    ref = reference(x, w1, b1, w2, b2)

    out_f32 = jax.block_until_ready(
        dist_projector(x, w1, b1, w2, b2, compute_dtype=jnp.float32))
    assert out_f32.shape == (B, OUT_DIM), out_f32.shape
    assert jnp.allclose(out_f32, ref, atol=1e-4, rtol=1e-4), (
        float(jnp.max(jnp.abs(out_f32 - ref))))

    out_bf16 = jax.block_until_ready(dist_projector(x, w1, b1, w2, b2))
    assert out_bf16.shape == (B, OUT_DIM), out_bf16.shape
    assert jnp.allclose(out_bf16, ref, atol=5e-2, rtol=5e-2), (
        float(jnp.max(jnp.abs(out_bf16 - ref))))

    # Multi-tile path: non-multiple-of-8 batch with a small tile size to exercise
    # the grid, row padding, and the lane-dense output slice.
    B2 = 300
    x2 = jax.random.normal(jax.random.fold_in(kx, 1), (B2, IN_DIM), jnp.float32)
    ref2 = reference(x2, w1, b1, w2, b2)
    out2 = jax.block_until_ready(
        dist_projector(x2, w1, b1, w2, b2, compute_dtype=jnp.float32, tb=128))
    assert out2.shape == (B2, OUT_DIM), out2.shape
    assert jnp.allclose(out2, ref2, atol=1e-4, rtol=1e-4), (
        float(jnp.max(jnp.abs(out2 - ref2))))

    print("KERNEL_OK")
</pallas_src>

<mosaic_0001>
module attributes {stable_mosaic.version = 11 : i64} {
  func.func @_dist_projector_kernel(%arg0: i32, %arg1: memref<8x600xf32, #tpu.memory_space<vmem>>, %arg2: memref<600x256xf32, #tpu.memory_space<vmem>>, %arg3: memref<1x256xf32, #tpu.memory_space<vmem>>, %arg4: memref<256x128xf32, #tpu.memory_space<vmem>>, %arg5: memref<1x128xf32, #tpu.memory_space<vmem>>, %arg6: memref<8x128xf32, #tpu.memory_space<vmem>>) attributes {dimension_semantics = [#tpu.dimension_semantics<parallel>], iteration_bounds = array<i64: 1>, scalar_prefetch = 0 : i64, scratch_operands = 0 : i64, tpu.core_type = #tpu.core_type<tc>, window_params = [{transform_indices = @transform_0, window_bounds = array<i64: 8, 600>}, {pipeline_mode = #tpu.pipeline_mode<synchronous>, transform_indices = @transform_1, window_bounds = array<i64: 600, 256>}, {pipeline_mode = #tpu.pipeline_mode<synchronous>, transform_indices = @transform_2, window_bounds = array<i64: 1, 256>}, {pipeline_mode = #tpu.pipeline_mode<synchronous>, transform_indices = @transform_3, window_bounds = array<i64: 256, 128>}, {pipeline_mode = #tpu.pipeline_mode<synchronous>, transform_indices = @transform_4, window_bounds = array<i64: 1, 128>}, {transform_indices = @transform_5, window_bounds = array<i64: 8, 128>}]} {
    %c0 = arith.constant 0 : index
    %c0_0 = arith.constant 0 : index
    %0 = vector.load %arg1[%c0, %c0_0] : memref<8x600xf32, #tpu.memory_space<vmem>>, vector<8x600xf32>
    %c0_1 = arith.constant 0 : index
    %c0_2 = arith.constant 0 : index
    %1 = vector.load %arg2[%c0_1, %c0_2] : memref<600x256xf32, #tpu.memory_space<vmem>>, vector<600x256xf32>
    %cst = arith.constant dense<0.000000e+00> : vector<8x256xf32>
    %2 = tpu.matmul %0, %1, %cst {dimension_numbers = #tpu.dot_dimension_numbers<[1], [0], [0], [1], [0, 0, 1, 1], [], []>} : vector<8x600xf32>, vector<600x256xf32>, vector<8x256xf32> -> vector<8x256xf32>
    %c0_3 = arith.constant 0 : index
    %c0_4 = arith.constant 0 : index
    %3 = vector.load %arg3[%c0_3, %c0_4] : memref<1x256xf32, #tpu.memory_space<vmem>>, vector<1x256xf32>
    %4 = vector.broadcast %3 : vector<1x256xf32> to vector<8x256xf32>
    %5 = arith.addf %2, %4 : vector<8x256xf32>
    %cst_5 = arith.constant 0.000000e+00 : f32
    %6 = vector.broadcast %cst_5 : f32 to vector<8x256xf32>
    %7 = arith.maximumf %5, %6 : vector<8x256xf32>
    %c0_6 = arith.constant 0 : index
    %c0_7 = arith.constant 0 : index
    %8 = vector.load %arg4[%c0_6, %c0_7] : memref<256x128xf32, #tpu.memory_space<vmem>>, vector<256x128xf32>
    %cst_8 = arith.constant dense<0.000000e+00> : vector<8x128xf32>
    %9 = tpu.matmul %7, %8, %cst_8 {dimension_numbers = #tpu.dot_dimension_numbers<[1], [0], [0], [1], [0, 0, 1, 1], [], []>} : vector<8x256xf32>, vector<256x128xf32>, vector<8x128xf32> -> vector<8x128xf32>
    %c0_9 = arith.constant 0 : index
    %c0_10 = arith.constant 0 : index
    %10 = vector.load %arg5[%c0_9, %c0_10] : memref<1x128xf32, #tpu.memory_space<vmem>>, vector<1x128xf32>
    %11 = vector.broadcast %10 : vector<1x128xf32> to vector<8x128xf32>
    %12 = arith.addf %9, %11 : vector<8x128xf32>
    %c0_11 = arith.constant 0 : index
    %c0_12 = arith.constant 0 : index
    %13 = vector.load %arg6[%c0_11, %c0_12] : memref<8x128xf32, #tpu.memory_space<vmem>>, vector<8x128xf32>
    tpu.vector_store %arg6[%c0_11, %c0_12], %12 {strides = array<i32>} : memref<8x128xf32, #tpu.memory_space<vmem>>, vector<8x128xf32>,
    return
  }
  func.func @transform_0(%arg0: i32) -> (i32, i32) {
    %c0_i32 = arith.constant 0 : i32
    %c0_i32_0 = arith.constant 0 : i32
    return %arg0, %c0_i32 : i32, i32
  }
  func.func @transform_1(%arg0: i32) -> (i32, i32) {
    %c0_i32 = arith.constant 0 : i32
    %c0_i32_0 = arith.constant 0 : i32
    %c0_i32_1 = arith.constant 0 : i32
    return %c0_i32, %c0_i32_0 : i32, i32
  }
  func.func @transform_2(%arg0: i32) -> (i32, i32) {
    %c0_i32 = arith.constant 0 : i32
    %c0_i32_0 = arith.constant 0 : i32
    %c0_i32_1 = arith.constant 0 : i32
    return %c0_i32, %c0_i32_0 : i32, i32
  }
  func.func @transform_3(%arg0: i32) -> (i32, i32) {
    %c0_i32 = arith.constant 0 : i32
    %c0_i32_0 = arith.constant 0 : i32
    %c0_i32_1 = arith.constant 0 : i32
    return %c0_i32, %c0_i32_0 : i32, i32
  }
  func.func @transform_4(%arg0: i32) -> (i32, i32) {
    %c0_i32 = arith.constant 0 : i32
    %c0_i32_0 = arith.constant 0 : i32
    %c0_i32_1 = arith.constant 0 : i32
    return %c0_i32, %c0_i32_0 : i32, i32
  }
  func.func @transform_5(%arg0: i32) -> (i32, i32) {
    %c0_i32 = arith.constant 0 : i32
    %c0_i32_0 = arith.constant 0 : i32
    return %arg0, %c0_i32 : i32, i32
  }
}

</mosaic_0001>

<bundles_post_ra>
// kernel: tpu_custom_call.1
= control target key start
LH: loop header
LB: loop body
LE: loop exit
PB: predicated region body
PF: predicated region fallthrough
CT: control target
= control target key end

     0   :  { %10 = vsyncpa [#allocation3], 0  ;;  %s762_s0 = inlined_call_operand.hbm [shape: f32[8,600], index: 0, kind: input, shape index: {}]   ;;  %s763_s1 = inlined_call_operand.hbm [shape: f32[600,256], index: 1, kind: input, shape index: {}]   ;;  %s764_s2 = inlined_call_operand.hbm [shape: f32[1,256], index: 2, kind: input, shape index: {}]   ;;  %s765_s3 = inlined_call_operand.hbm [shape: f32[256,128], index: 3, kind: input, shape index: {}]   ;;  %s766_s4 = inlined_call_operand.vmem [shape: f32[1,128], index: 4, kind: input, shape index: {}]   ;;  %s767_s5 = inlined_call_operand.hbm [shape: f32[8,128], index: 5, kind: output, shape index: {}]  }
   0x1   :  { %11 = vsyncpa [#allocation6], 0 }
   0x2   :  { %12 = vsyncpa [#allocation9], 0  ;;  %s29_s20 = sshll.u32 %s763_s1, 4  ;;  %s30_s20 = int_to_ptr.hbm [resolvable:$true] %s29_s20 }
   0x3   :  { %13 = vsyncpa [#allocation4], 0  ;;  %s683_s21 = smov [#allocation5]   ;;  %s19_s25 = sshll.u32 %s762_s0, 4  ;;  %s20_s25 = int_to_ptr.hbm [resolvable:$true] %s19_s25 }
   0x4   :  { %s31_s22 = sshll.u32 %s683_s21, 4  ;;  %s684_s26 = smov 256   ;;  %s32_s22 = int_to_ptr.vmem [resolvable:$true] %s31_s22 }
   0x5   :  { %s685_s27 = smov 16   ;;  %s686_s28 = smov [#allocation2]  }
   0x6   :  { %37 = dma.hbm_to_vmem [thread:$0]  %s30_s20, 19200, %s32_s22, [#allocation6], %s684_s26, %s684_s26, %s685_s27  }
   0x7   :  { %s21_s29 = sshll.u32 %s686_s28, 4  ;;  %s43_s7 = sshll.u32 %s764_s2, 4  ;;  %s22_s29 = int_to_ptr.vmem [resolvable:$true] %s21_s29  ;;  %s44_s7 = int_to_ptr.hbm [resolvable:$true] %s43_s7 }
   0x8   :  { %24 = dma.hbm_to_vmem [thread:$0]  %s20_s25, 640, %s22_s29, [#allocation3]  }
   0x9   :  { %s53_s9 = sshll.u32 %s765_s3, 4  ;;  %s687_s10 = smov [#allocation7]   ;;  %s54_s9 = int_to_ptr.hbm [resolvable:$true] %s53_s9 }
   0xa   :  { %s45_s11 = sshll.u32 %s687_s10, 4  ;;  %s688_s0 = smov [#allocation8]   ;;  %s46_s11 = int_to_ptr.vmem [resolvable:$true] %s45_s11 }
   0xb   :  { %48 = dma.hbm_to_vmem [thread:$0]  %s44_s7, 32, %s46_s11, [#allocation6]  }
   0xc   :  { %s55_s12 = sshll.u32 %s688_s0, 4  ;;  %s689_s13 = smov 128   ;;  %s56_s12 = int_to_ptr.vmem [resolvable:$true] %s55_s12 }
   0xd   :  { %s690_s14 = smov 8  }
   0xe   :  { %61 = dma.hbm_to_vmem [thread:$0]  %s54_s9, 4096, %s56_s12, [#allocation9], %s689_s13, %s689_s13, %s690_s14  }
   0xf   :  { %675 = dma.done.wait [#allocation3], 640  }
  0x10   :  { %676 = vsyncadd [#allocation3], 4294966656 }
  0x11   :  { %677 = dma.done.wait [#allocation6], 19232  }
  0x12   :  { %678 = vsyncadd [#allocation6], 4294948064 }
  0x13   :  { %679 = dma.done.wait [#allocation9], 4096  }
  0x14   :  { %680 = vsyncadd [#allocation9], 4294963200  ;;  %v115_v0 = vld [vmem:[#allocation5 + $0xf0] sm:$0xff]  ;;  %v113_v1 = vld [vmem:[#allocation5 + $0xe0] sm:$0xff]  ;;  %vm241_vm0 = vcmask 719872   ;;  %s691_s15 = smov [#allocation10]  }
  0x15   :  { %v147_v2 = vld [vmem:[#allocation5 + $0x1f0] sm:$0xff]  ;;  %245 = vmatpush.msra.mxu0 %v115_v0  ;;  %v145_v3 = vld [vmem:[#allocation5 + $0x1e0] sm:$0xff]  ;;  %v116_v60 = vld [vmem:[#allocation5 + $0xf8] sm:$0xff]  ;;  %s529_s16 = sshll.u32 %s691_s15, 4  ;;  %s531_s19 = sshll.u32 %s767_s5, 4  ;;  %s530_s16 = int_to_ptr.vmem [resolvable:$true] %s529_s16  ;;  %s532_s19 = int_to_ptr.hbm [resolvable:$true] %s531_s19 }
  0x16   :  { %265 = vmatpush.msra.mxu1 %v147_v2  ;;  %v111_v4 = vld [vmem:[#allocation5 + $0xd0] sm:$0xff]  ;;  %v109_v7 = vld [vmem:[#allocation5 + $0xc0] sm:$0xff]  ;;  %v114_v0 = vld [vmem:[#allocation5 + $0xe8] sm:$0xff] }
  0x17   :  { %v143_v5 = vld [vmem:[#allocation5 + $0x1d0] sm:$0xff]  ;;  %246 = vmatpush.msra.mxu0 %v113_v1  ;;  %v141_v8 = vld [vmem:[#allocation5 + $0x1c0] sm:$0xff] }
  0x18   :  { %266 = vmatpush.msra.mxu1 %v145_v3  ;;  %v179_v6 = vld [vmem:[#allocation5 + $0x2f0] sm:$0xff]  ;;  %v177_v9 = vld [vmem:[#allocation5 + $0x2e0] sm:$0xff] }
  0x19   :  { %285 = vmatpush.msra.mxu2 %v179_v6  ;;  %247 = vmatpush.msra.mxu0 %v111_v4  ;;  %v107_v10 = vld [vmem:[#allocation5 + $0xb0] sm:$0xff]  ;;  %v209_v14 = vld [vmem:[#allocation5 + $0x3e0] sm:$0xff]  ;;  %v112_v4 = vld [vmem:[#allocation5 + $0xd8] sm:$0xff] }
  0x1a   :  { %267 = vmatpush.msra.mxu1 %v143_v5  ;;  %v211_v11 = vld [vmem:[#allocation5 + $0x3f0] sm:$0xff]  ;;  %v173_v15 = vld [vmem:[#allocation5 + $0x2c0] sm:$0xff]  ;;  %v148_v5 = vld [vmem:[#allocation5 + $0x1f8] sm:$0xff] }
  0x1b   :  { %v139_v12 = vld [vmem:[#allocation5 + $0x1b0] sm:$0xff]  ;;  %286 = vmatpush.msra.mxu2 %v177_v9  ;;  %305 = vmatpush.msra.mxu3 %v211_v11  ;;  %v105_v17 = vld [vmem:[#allocation5 + $0xa0] sm:$0xff]  ;;  %v146_v9 = vld [vmem:[#allocation5 + $0x1e8] sm:$0xff] }
  0x1c   :  { %v175_v13 = vld [vmem:[#allocation5 + $0x2d0] sm:$0xff]  ;;  %248 = vmatpush.msra.mxu0 %v109_v7  ;;  %268 = vmatpush.msra.mxu1 %v141_v8  ;;  %v137_v18 = vld [vmem:[#allocation5 + $0x1a0] sm:$0xff]  ;;  %v110_v8 = vld [vmem:[#allocation5 + $0xc8] sm:$0xff] }
  0x1d   :  { %v207_v16 = vld [vmem:[#allocation5 + $0x3d0] sm:$0xff]  ;;  %287 = vmatpush.msra.mxu2 %v175_v13  ;;  %306 = vmatpush.msra.mxu3 %v209_v14  ;;  %v205_v20 = vld [vmem:[#allocation5 + $0x3c0] sm:$0xff]  ;;  %v144_v13 = vld [vmem:[#allocation5 + $0x1d8] sm:$0xff] }
  0x1e   :  { %249 = vmatpush.msra.mxu0 %v107_v10  ;;  %269 = vmatpush.msra.mxu1 %v139_v12  ;;  %v171_v19 = vld [vmem:[#allocation5 + $0x2b0] sm:$0xff]  ;;  %v169_v23 = vld [vmem:[#allocation5 + $0x2a0] sm:$0xff]  ;;  %v180_v10 = vld [vmem:[#allocation5 + $0x2f8] sm:$0xff] }
  0x1f   :  { %v103_v21 = vld [vmem:[#allocation5 + $0x90] sm:$0xff]  ;;  %288 = vmatpush.msra.mxu2 %v173_v15  ;;  %307 = vmatpush.msra.mxu3 %v207_v16  ;;  %v101_v25 = vld [vmem:[#allocation5 + $0x80] sm:$0xff]  ;;  %v108_v12 = vld [vmem:[#allocation5 + $0xb8] sm:$0xff] }
  0x20   :  { %v135_v22 = vld [vmem:[#allocation5 + $0x190] sm:$0xff]  ;;  %250 = vmatpush.msra.mxu0 %v105_v17  ;;  %270 = vmatpush.msra.mxu1 %v137_v18  ;;  %v133_v26 = vld [vmem:[#allocation5 + $0x180] sm:$0xff]  ;;  %v178_v14 = vld [vmem:[#allocation5 + $0x2e8] sm:$0xff] }
  0x21   :  { %v203_v24 = vld [vmem:[#allocation5 + $0x3b0] sm:$0xff]  ;;  %289 = vmatpush.msra.mxu2 %v171_v19  ;;  %308 = vmatpush.msra.mxu3 %v205_v20  ;;  %v201_v28 = vld [vmem:[#allocation5 + $0x3a0] sm:$0xff]  ;;  %v106_v16 = vld [vmem:[#allocation5 + $0xa8] sm:$0xff] }
  0x22   :  { %251 = vmatpush.msra.mxu0 %v103_v21  ;;  %271 = vmatpush.msra.mxu1 %v135_v22  ;;  %v167_v27 = vld [vmem:[#allocation5 + $0x290] sm:$0xff]  ;;  %v165_v31 = vld [vmem:[#allocation5 + $0x280] sm:$0xff]  ;;  %v142_v17 = vld [vmem:[#allocation5 + $0x1c8] sm:$0xff] }
  0x23   :  { %v99_v29 = vld [vmem:[#allocation5 + $0x70] sm:$0xff]  ;;  %290 = vmatpush.msra.mxu2 %v169_v23  ;;  %309 = vmatpush.msra.mxu3 %v203_v24  ;;  %v97_v33 = vld [vmem:[#allocation5 + $0x60] sm:$0xff]  ;;  %v176_v18 = vld [vmem:[#allocation5 + $0x2d8] sm:$0xff] }
  0x24   :  { %v131_v30 = vld [vmem:[#allocation5 + $0x170] sm:$0xff]  ;;  %252 = vmatpush.msra.mxu0 %v101_v25  ;;  %272 = vmatpush.msra.mxu1 %v133_v26  ;;  %v129_v34 = vld [vmem:[#allocation5 + $0x160] sm:$0xff]  ;;  %v104_v20 = vld [vmem:[#allocation5 + $0x98] sm:$0xff] }
  0x25   :  { %v199_v32 = vld [vmem:[#allocation5 + $0x390] sm:$0xff]  ;;  %291 = vmatpush.msra.mxu2 %v167_v27  ;;  %310 = vmatpush.msra.mxu3 %v201_v28  ;;  %v197_v36 = vld [vmem:[#allocation5 + $0x380] sm:$0xff]  ;;  %v734_v21 = vld [vmem:[#allocation2 + $0x10] sm:$0xff] }
  0x26   :  { %253 = vmatpush.msra.mxu0 %v99_v29  ;;  %273 = vmatpush.msra.mxu1 %v131_v30  ;;  %v163_v35 = vld [vmem:[#allocation5 + $0x270] sm:$0xff]  ;;  %v161_v39 = vld [vmem:[#allocation5 + $0x260] sm:$0xff]  ;;  %v174_v22 = vld [vmem:[#allocation5 + $0x2c8] sm:$0xff] }
  0x27   :  { %v95_v37 = vld [vmem:[#allocation5 + $0x50] sm:$0xff]  ;;  %292 = vmatpush.msra.mxu2 %v165_v31  ;;  %311 = vmatpush.msra.mxu3 %v199_v32  ;;  %v93_v41 = vld [vmem:[#allocation5 + $0x40] sm:$0xff]  ;;  %v102_v24 = vld [vmem:[#allocation5 + $0x88] sm:$0xff] }
  0x28   :  { %v127_v38 = vld [vmem:[#allocation5 + $0x150] sm:$0xff]  ;;  %254 = vmatpush.msra.mxu0 %v97_v33  ;;  %274 = vmatpush.msra.mxu1 %v129_v34  ;;  %v125_v42 = vld [vmem:[#allocation5 + $0x140] sm:$0xff]  ;;  %v140_v25 = vld [vmem:[#allocation5 + $0x1b8] sm:$0xff] }
  0x29   :  { %v195_v40 = vld [vmem:[#allocation5 + $0x370] sm:$0xff]  ;;  %293 = vmatpush.msra.mxu2 %v163_v35  ;;  %312 = vmatpush.msra.mxu3 %v197_v36  ;;  %v193_v44 = vld [vmem:[#allocation5 + $0x360] sm:$0xff]  ;;  %v736_v26 = vld [vmem:[#allocation2] sm:$0xff] }
  0x2a   :  { %255 = vmatpush.msra.mxu0 %v95_v37  ;;  %275 = vmatpush.msra.mxu1 %v127_v38  ;;  %v159_v43 = vld [vmem:[#allocation5 + $0x250] sm:$0xff]  ;;  %v157_v47 = vld [vmem:[#allocation5 + $0x240] sm:$0xff]  ;;  %v100_v28 = vld [vmem:[#allocation5 + $0x78] sm:$0xff] }
  0x2b   :  { %v91_v45 = vld [vmem:[#allocation5 + $0x30] sm:$0xff]  ;;  %294 = vmatpush.msra.mxu2 %v161_v39  ;;  %313 = vmatpush.msra.mxu3 %v195_v40  ;;  %v89_v49 = vld [vmem:[#allocation5 + $0x20] sm:$0xff]  ;;  %v138_v30 = vld [vmem:[#allocation5 + $0x1a8] sm:$0xff] }
  0x2c   :  { %v123_v46 = vld [vmem:[#allocation5 + $0x130] sm:$0xff]  ;;  %256 = vmatpush.msra.mxu0 %v93_v41  ;;  %276 = vmatpush.msra.mxu1 %v125_v42  ;;  %v121_v50 = vld [vmem:[#allocation5 + $0x120] sm:$0xff]  ;;  %v98_v32 = vld [vmem:[#allocation5 + $0x68] sm:$0xff] }
  0x2d   :  { %v191_v48 = vld [vmem:[#allocation5 + $0x350] sm:$0xff]  ;;  %295 = vmatpush.msra.mxu2 %v159_v43  ;;  %314 = vmatpush.msra.mxu3 %v193_v44  ;;  %v189_v52 = vld [vmem:[#allocation5 + $0x340] sm:$0xff]  ;;  %v172_v33 = vld [vmem:[#allocation5 + $0x2b8] sm:$0xff] }
  0x2e   :  { %257 = vmatpush.msra.mxu0 %v91_v45  ;;  %277 = vmatpush.msra.mxu1 %v123_v46  ;;  %v155_v51 = vld [vmem:[#allocation5 + $0x230] sm:$0xff]  ;;  %v153_v55 = vld [vmem:[#allocation5 + $0x220] sm:$0xff]  ;;  %v96_v36 = vld [vmem:[#allocation5 + $0x58] sm:$0xff] }
  0x2f   :  { %v87_v53 = vld [vmem:[#allocation5 + $0x10] sm:$0xff]  ;;  %296 = vmatpush.msra.mxu2 %v157_v47  ;;  %315 = vmatpush.msra.mxu3 %v191_v48  ;;  %v85_v57 = vld [vmem:[#allocation5] sm:$0xff]  ;;  %v212_v37 = vld [vmem:[#allocation5 + $0x3f8] sm:$0xff] }
  0x30   :  { %v119_v54 = vld [vmem:[#allocation5 + $0x110] sm:$0xff]  ;;  %258 = vmatpush.msra.mxu0 %v89_v49  ;;  %278 = vmatpush.msra.mxu1 %v121_v50  ;;  %v117_v58 = vld [vmem:[#allocation5 + $0x100] sm:$0xff]  ;;  %v136_v38 = vld [vmem:[#allocation5 + $0x198] sm:$0xff] }
  0x31   :  { %v187_v56 = vld [vmem:[#allocation5 + $0x330] sm:$0xff]  ;;  %297 = vmatpush.msra.mxu2 %v155_v51  ;;  %316 = vmatpush.msra.mxu3 %v189_v52  ;;  %v233_v59 = vld [vmem:[#allocation5 + $0x4a0] sm:$0xff]  ;;  %v170_v39 = vld [vmem:[#allocation5 + $0x2a8] sm:$0xff] }
  0x32   :  { %259 = vmatpush.msra.mxu0 %v87_v53  ;;  %279 = vmatpush.msra.mxu1 %v119_v54  ;;  %v151_v61 = vld [vmem:[#allocation5 + $0x210] sm:$0xff]  ;;  %v185_v62 = vld [vmem:[#allocation5 + $0x320] sm:$0xff]  ;;  %v94_v40 = vld [vmem:[#allocation5 + $0x48] sm:$0xff] }
  0x33   :  { %298 = vmatpush.msra.mxu2 %v153_v55  ;;  %317 = vmatpush.msra.mxu3 %v187_v56  ;;  %v231_v63 = vld [vmem:[#allocation5 + $0x490] sm:$0xff]  ;;  %v149_v1 = vld [vmem:[#allocation5 + $0x200] sm:$0xff]  ;;  %v210_v41 = vld [vmem:[#allocation5 + $0x3e8] sm:$0xff] }
  0x34   :  { %260 = vmatpush.msra.mxu0 %v85_v57  ;;  %280 = vmatpush.msra.mxu1 %v117_v58  ;;  %v183_v2 = vld [vmem:[#allocation5 + $0x310] sm:$0xff]  ;;  %v229_v3 = vld [vmem:[#allocation5 + $0x480] sm:$0xff]  ;;  %v134_v42 = vld [vmem:[#allocation5 + $0x188] sm:$0xff] }
  0x35   :  { %299 = vmatpush.msra.mxu2 %v151_v61  ;;  %318 = vmatpush.msra.mxu3 %v185_v62  ;;  %v181_v6 = vld [vmem:[#allocation5 + $0x300] sm:$0xff]  ;;  %v227_v7 = vld [vmem:[#allocation5 + $0x470] sm:$0xff]  ;;  %v168_v43 = vld [vmem:[#allocation5 + $0x298] sm:$0xff] }
  0x36   :  { %330 = vmatpush.msrb.mxu0 %v233_v59  ;;  %345 = vmatpush.msrb.mxu1 %v116_v60  ;;  %v225_v11 = vld [vmem:[#allocation5 + $0x460] sm:$0xff]  ;;  %v223_v15 = vld [vmem:[#allocation5 + $0x450] sm:$0xff]  ;;  %v92_v44 = vld [vmem:[#allocation5 + $0x38] sm:$0xff] }
  0x37   :  { %300 = vmatpush.msra.mxu2 %v149_v1  ;;  %319 = vmatpush.msra.mxu3 %v183_v2  ;;  %v221_v19 = vld [vmem:[#allocation5 + $0x440] sm:$0xff]  ;;  %v219_v23 = vld [vmem:[#allocation5 + $0x430] sm:$0xff]  ;;  %v208_v45 = vld [vmem:[#allocation5 + $0x3d8] sm:$0xff] }
  0x38   :  { %331 = vmatpush.msrb.mxu0 %v231_v63  ;;  %346 = vmatpush.msrb.mxu1 %v114_v0  ;;  %v217_v27 = vld [vmem:[#allocation5 + $0x420] sm:$0xff]  ;;  %v739_v29 = vld [vmem:[#allocation2 + $0x18] sm:$0xff]  ;;  %v132_v46 = vld [vmem:[#allocation5 + $0x178] sm:$0xff] }
  0x39   :  { %365 = vmatpush.msrb.mxu2 %v148_v5  ;;  %320 = vmatpush.msra.mxu3 %v181_v6  ;;  %v215_v31 = vld [vmem:[#allocation5 + $0x410] sm:$0xff]  ;;  %v742_v34 = vld [vmem:[#allocation2 + $0x8] sm:$0xff]  ;;  %v166_v47 = vld [vmem:[#allocation5 + $0x288] sm:$0xff] }
  0x3a   :  { %332 = vmatpush.msrb.mxu0 %v229_v3  ;;  %347 = vmatpush.msrb.mxu1 %v112_v4  ;;  %v213_v35 = vld [vmem:[#allocation5 + $0x400] sm:$0xff]  ;;  %v90_v48 = vld [vmem:[#allocation5 + $0x28] sm:$0xff]  ;;  %v746_v51 = vld [vmem:[#allocation2 + $0x20] sm:$0xff] }
  0x3b   :  { %366 = vmatpush.msrb.mxu2 %v146_v9  ;;  %385 = vmatpush.msrb.mxu3 %v180_v10  ;;  %v206_v49 = vld [vmem:[#allocation5 + $0x3c8] sm:$0xff]  ;;  %v164_v52 = vld [vmem:[#allocation5 + $0x278] sm:$0xff] }
  0x3c   :  { %333 = vmatpush.msrb.mxu0 %v227_v7  ;;  %348 = vmatpush.msrb.mxu1 %v110_v8  ;;  %v130_v50 = vld [vmem:[#allocation5 + $0x168] sm:$0xff]  ;;  %v204_v53 = vld [vmem:[#allocation5 + $0x3b8] sm:$0xff] }
  0x3d   :  { %367 = vmatpush.msrb.mxu2 %v144_v13  ;;  %386 = vmatpush.msrb.mxu3 %v178_v14  ;;  %v88_v54 = vld [vmem:[#allocation5 + $0x18] sm:$0xff]  ;;  %v162_v56 = vld [vmem:[#allocation5 + $0x268] sm:$0xff] }
  0x3e   :  { %334 = vmatpush.msrb.mxu0 %v225_v11  ;;  %349 = vmatpush.msrb.mxu1 %v108_v12  ;;  %v128_v55 = vld [vmem:[#allocation5 + $0x158] sm:$0xff]  ;;  %v202_v57 = vld [vmem:[#allocation5 + $0x3a8] sm:$0xff] }
  0x3f   :  { %368 = vmatpush.msrb.mxu2 %v142_v17  ;;  %387 = vmatpush.msrb.mxu3 %v176_v18  ;;  %v86_v58 = vld [vmem:[#allocation5 + $0x8] sm:$0xff]  ;;  %v160_v60 = vld [vmem:[#allocation5 + $0x258] sm:$0xff] }
  0x40   :  { %335 = vmatpush.msrb.mxu0 %v223_v15  ;;  %350 = vmatpush.msrb.mxu1 %v106_v16  ;;  %v126_v59 = vld [vmem:[#allocation5 + $0x148] sm:$0xff]  ;;  %v200_v61 = vld [vmem:[#allocation5 + $0x398] sm:$0xff] }
  0x41   :  { %301 = vmatmul.f32.vlgmr.msra.gmra.mxu2 %v734_v21  ;;  %388 = vmatpush.msrb.mxu3 %v174_v22  ;;  %v234_v62 = vld [vmem:[#allocation5 + $0x4a8] sm:$0xff]  ;;  %v124_v63 = vld [vmem:[#allocation5 + $0x138] sm:$0xff] }
  0x42   :  { %336 = vmatpush.msrb.mxu0 %v221_v19  ;;  %351 = vmatpush.msrb.mxu1 %v104_v20  ;;  %v158_v0 = vld [vmem:[#allocation5 + $0x248] sm:$0xff]  ;;  %v232_v2 = vld [vmem:[#allocation5 + $0x498] sm:$0xff] }
  0x43   :  { %369 = vmatpush.msrb.mxu2 %v140_v25  ;;  %261 = vmatmul.f32.vlgmr.msra.gmra.mxu0 %v736_v26  ;;  %v198_v1 = vld [vmem:[#allocation5 + $0x388] sm:$0xff]  ;;  %v156_v4 = vld [vmem:[#allocation5 + $0x238] sm:$0xff] }
  0x44   :  { %337 = vmatpush.msrb.mxu0 %v219_v23  ;;  %352 = vmatpush.msrb.mxu1 %v102_v24  ;;  %v122_v3 = vld [vmem:[#allocation5 + $0x128] sm:$0xff]  ;;  %v196_v5 = vld [vmem:[#allocation5 + $0x378] sm:$0xff] }
  0x45   :  { %321 = vmatmul.f32.vlgmr.msra.gmra.mxu3 %v739_v29  ;;  %370 = vmatpush.msrb.mxu2 %v138_v30  ;;  %v230_v6 = vld [vmem:[#allocation5 + $0x488] sm:$0xff]  ;;  %v120_v7 = vld [vmem:[#allocation5 + $0x118] sm:$0xff] }
  0x46   :  { %338 = vmatpush.msrb.mxu0 %v217_v27  ;;  %353 = vmatpush.msrb.mxu1 %v100_v28  ;;  %v154_v8 = vld [vmem:[#allocation5 + $0x228] sm:$0xff]  ;;  %v228_v10 = vld [vmem:[#allocation5 + $0x478] sm:$0xff] }
  0x47   :  { %389 = vmatpush.msrb.mxu3 %v172_v33  ;;  %281 = vmatmul.f32.vlgmr.msra.gmra.mxu1 %v742_v34  ;;  %v194_v9 = vld [vmem:[#allocation5 + $0x368] sm:$0xff]  ;;  %v152_v12 = vld [vmem:[#allocation5 + $0x218] sm:$0xff] }
  0x48   :  { %339 = vmatpush.msrb.mxu0 %v215_v31  ;;  %354 = vmatpush.msrb.mxu1 %v98_v32  ;;  %v118_v11 = vld [vmem:[#allocation5 + $0x108] sm:$0xff]  ;;  %v192_v13 = vld [vmem:[#allocation5 + $0x358] sm:$0xff] }
  0x49   :  { %371 = vmatpush.msrb.mxu2 %v136_v38  ;;  %390 = vmatpush.msrb.mxu3 %v170_v39  ;;  %v226_v14 = vld [vmem:[#allocation5 + $0x468] sm:$0xff]  ;;  %v224_v17 = vld [vmem:[#allocation5 + $0x458] sm:$0xff] }
  0x4a   :  { %340 = vmatpush.msrb.mxu0 %v213_v35  ;;  %355 = vmatpush.msrb.mxu1 %v96_v36  ;;  %v150_v15 = vld [vmem:[#allocation5 + $0x208] sm:$0xff]  ;;  %v188_v18 = vld [vmem:[#allocation5 + $0x338] sm:$0xff] }
  0x4b   :  { %372 = vmatpush.msrb.mxu2 %v134_v42  ;;  %391 = vmatpush.msrb.mxu3 %v168_v43  ;;  %v190_v16 = vld [vmem:[#allocation5 + $0x348] sm:$0xff]  ;;  %v220_v23 = vld [vmem:[#allocation5 + $0x438] sm:$0xff] }
  0x4c   :  { %405 = vmatpush.msra.mxu0 %v212_v37  ;;  %356 = vmatpush.msrb.mxu1 %v94_v40  ;;  %v222_v19 = vld [vmem:[#allocation5 + $0x448] sm:$0xff]  ;;  %v184_v25 = vld [vmem:[#allocation5 + $0x318] sm:$0xff] }
  0x4d   :  { %373 = vmatpush.msrb.mxu2 %v132_v46  ;;  %392 = vmatpush.msrb.mxu3 %v166_v47  ;;  %v462_v20 = vld [vmem:[#allocation8 + $0x78] sm:$0xff]  ;;  %v461_v24 = vld [vmem:[#allocation8 + $0x70] sm:$0xff]  ;;  %v460_v28 = vld [vmem:[#allocation8 + $0x68] sm:$0xff] }
  0x4e   :  { %406 = vmatpush.msra.mxu0 %v210_v41  ;;  %357 = vmatpush.msrb.mxu1 %v92_v44  ;;  %v186_v22 = vld [vmem:[#allocation5 + $0x328] sm:$0xff]  ;;  %v216_v31 = vld [vmem:[#allocation5 + $0x418] sm:$0xff] }
  0x4f   :  { %374 = vmatpush.msrb.mxu2 %v130_v50  ;;  %543 = vmatmul.msk.f32.vlgmr.msrb.gmra.mxu0 %vm241_vm0, %v746_v51  ;;  %v218_v27 = vld [vmem:[#allocation5 + $0x428] sm:$0xff]  ;;  %v459_v32 = vld [vmem:[#allocation8 + $0x60] sm:$0xff]  ;;  %v452_v38 = vld [vmem:[#allocation8 + $0x28] sm:$0xff] }
  0x50   :  { %407 = vmatpush.msra.mxu0 %v208_v45  ;;  %358 = vmatpush.msrb.mxu1 %v90_v48  ;;  %v182_v30 = vld [vmem:[#allocation5 + $0x308] sm:$0xff]  ;;  %v455_v35 = vld [vmem:[#allocation8 + $0x40] sm:$0xff]  ;;  %v448_v43 = vld [vmem:[#allocation8 + $0x8] sm:$0xff] }
  0x51   :  { %393 = vmatpush.msrb.mxu3 %v164_v52  ;;  %375 = vmatpush.msrb.mxu2 %v128_v55  ;;  %v457_v33 = vld [vmem:[#allocation8 + $0x50] sm:$0xff]  ;;  %v454_v36 = vld [vmem:[#allocation8 + $0x38] sm:$0xff]  ;;  %v451_v39 = vld [vmem:[#allocation8 + $0x20] sm:$0xff] }
  0x52   :  { %408 = vmatpush.msra.mxu0 %v206_v49  ;;  %359 = vmatpush.msrb.mxu1 %v88_v54  ;;  %v453_v37 = vld [vmem:[#allocation8 + $0x30] sm:$0xff]  ;;  %v478_v40 = vld [vmem:[#allocation8 + $0xf8] sm:$0xff]  ;;  %v476_v44 = vld [vmem:[#allocation8 + $0xe8] sm:$0xff] }
  0x53   :  { %394 = vmatpush.msrb.mxu3 %v162_v56  ;;  %376 = vmatpush.msrb.mxu2 %v126_v59  ;;  %v449_v41 = vld [vmem:[#allocation8 + $0x10] sm:$0xff]  ;;  %v447_v45 = vld [vmem:[#allocation8] sm:$0xff]  ;;  %v474_v47 = vld [vmem:[#allocation8 + $0xd8] sm:$0xff] }
  0x54   :  { %409 = vmatpush.msra.mxu0 %v204_v53  ;;  %360 = vmatpush.msrb.mxu1 %v86_v58  ;;  %v477_v42 = vld [vmem:[#allocation8 + $0xf0] sm:$0xff]  ;;  %v475_v46 = vld [vmem:[#allocation8 + $0xe0] sm:$0xff]  ;;  %v472_v49 = vld [vmem:[#allocation8 + $0xc8] sm:$0xff] }
  0x55   :  { %395 = vmatpush.msrb.mxu3 %v160_v60  ;;  %377 = vmatpush.msrb.mxu2 %v124_v63  ;;  %v473_v48 = vld [vmem:[#allocation8 + $0xd0] sm:$0xff]  ;;  %v471_v50 = vld [vmem:[#allocation8 + $0xc0] sm:$0xff]  ;;  %v470_v52 = vld [vmem:[#allocation8 + $0xb8] sm:$0xff] }
  0x56   :  { %410 = vmatpush.msra.mxu0 %v202_v57  ;;  %430 = vmatpush.msra.mxu1 %v234_v62  ;;  %v469_v54 = vld [vmem:[#allocation8 + $0xb0] sm:$0xff]  ;;  %v468_v56 = vld [vmem:[#allocation8 + $0xa8] sm:$0xff]  ;;  %v467_v58 = vld [vmem:[#allocation8 + $0xa0] sm:$0xff] }
  0x57   :  { %396 = vmatpush.msrb.mxu3 %v158_v0  ;;  %378 = vmatpush.msrb.mxu2 %v122_v3  ;;  %v465_v63 = vld [vmem:[#allocation8 + $0x90] sm:$0xff] }
  0x58   :  { %411 = vmatpush.msra.mxu0 %v200_v61  ;;  %431 = vmatpush.msra.mxu1 %v232_v2  ;;  %v466_v61 = vld [vmem:[#allocation8 + $0x98] sm:$0xff]  ;;  %v464_v2 = vld [vmem:[#allocation8 + $0x88] sm:$0xff] }
  0x59   :  { %397 = vmatpush.msrb.mxu3 %v156_v4  ;;  %379 = vmatpush.msrb.mxu2 %v120_v7  ;;  %v463_v4 = vld [vmem:[#allocation8 + $0x80] sm:$0xff] }
  0x5a   :  { %412 = vmatpush.msra.mxu0 %v198_v1  ;;  %432 = vmatpush.msra.mxu1 %v230_v6 }
  0x5b   :  { %398 = vmatpush.msrb.mxu3 %v154_v8  ;;  %380 = vmatpush.msrb.mxu2 %v118_v11 }
  0x5c   :  { %413 = vmatpush.msra.mxu0 %v196_v5  ;;  %433 = vmatpush.msra.mxu1 %v228_v10 }
  0x5d   :  { %399 = vmatpush.msrb.mxu3 %v152_v12  ;;  %381 = vmatmul.f32.vlgmr.msrb.gmra.mxu2 %v742_v34  ;;  %v456_v34 = vld [vmem:[#allocation8 + $0x48] sm:$0xff] }
  0x5e   :  { %414 = vmatpush.msra.mxu0 %v194_v9  ;;  %434 = vmatpush.msra.mxu1 %v226_v14 }
  0x5f   :  { %400 = vmatpush.msrb.mxu3 %v150_v15  ;;  %361 = vmatmul.f32.vlgmr.msrb.gmra.mxu1 %v736_v26  ;;  %v458_v26 = vld [vmem:[#allocation8 + $0x58] sm:$0xff] }
  0x60   :  { %415 = vmatpush.msra.mxu0 %v192_v13  ;;  %435 = vmatpush.msra.mxu1 %v224_v17 }
  0x61   :  { %401 = vmatmul.f32.vlgmr.msrb.gmra.mxu3 %v734_v21  ;;  %483 = vmatpush.msra.mxu2 %v462_v20  ;;  %v214_v21 = vld [vmem:[#allocation5 + $0x408] sm:$0xff]  ;;  %v554_v20 = vld [vmem:[%s766_s4] ss:$0 sm:$0xff] }
  0x62   :  { %416 = vmatpush.msra.mxu0 %v190_v16  ;;  %436 = vmatpush.msra.mxu1 %v222_v19 }
  0x63   :  { %484 = vmatpush.msra.mxu2 %v461_v24  ;;  %503 = vmatpush.msra.mxu3 %v478_v40 }
  0x64   :  { %417 = vmatpush.msra.mxu0 %v188_v18  ;;  %437 = vmatpush.msra.mxu1 %v220_v23 }
  0x65   :  { %485 = vmatpush.msra.mxu2 %v460_v28  ;;  %504 = vmatpush.msra.mxu3 %v477_v42 }
  0x66   :  { %418 = vmatpush.msra.mxu0 %v186_v22  ;;  %438 = vmatpush.msra.mxu1 %v218_v27 }
  0x67   :  { %486 = vmatpush.msra.mxu2 %v459_v32  ;;  %505 = vmatpush.msra.mxu3 %v476_v44 }
  0x68   :  { %419 = vmatpush.msra.mxu0 %v184_v25  ;;  %439 = vmatpush.msra.mxu1 %v216_v31 }
  0x69   :  { %487 = vmatpush.msra.mxu2 %v458_v26  ;;  %506 = vmatpush.msra.mxu3 %v475_v46 }
  0x6a   :  { %420 = vmatpush.msra.mxu0 %v182_v30  ;;  %440 = vmatpush.msra.mxu1 %v214_v21 }
  0x6b   :  { %421 = vmatmul.f32.vlgmr.msra.gmra.mxu0 %v739_v29  ;;  %544 = vmatmul.msk.f32.vlgmr.msra.gmra.mxu1 %vm241_vm0, %v746_v51  ;;  %v450_v29 = vld [vmem:[#allocation8 + $0x18] sm:$0xff] }
  0x6c   :  { %488 = vmatpush.msra.mxu2 %v457_v33  ;;  %507 = vmatpush.msra.mxu3 %v474_v47  ;;  %v235_v51 = vld [vmem:[#allocation7] sm:$0x3] }
  0x6d   :  { %v237_v53 = vperm.slane %v235_v51, 0  ;;  %v238_v8 = vperm.slane %v235_v51, 1 }
  0x6e   :  { %489 = vmatpush.msra.mxu2 %v456_v34  ;;  %508 = vmatpush.msra.mxu3 %v473_v48 }
  0x70   :  { %490 = vmatpush.msra.mxu2 %v455_v35  ;;  %509 = vmatpush.msra.mxu3 %v472_v49 }
  0x72   :  { %491 = vmatpush.msra.mxu2 %v454_v36  ;;  %510 = vmatpush.msra.mxu3 %v471_v50 }
  0x74   :  { %492 = vmatpush.msra.mxu2 %v453_v37  ;;  %511 = vmatpush.msra.mxu3 %v470_v52 }
  0x76   :  { %493 = vmatpush.msra.mxu2 %v452_v38  ;;  %512 = vmatpush.msra.mxu3 %v469_v54 }
  0x78   :  { %494 = vmatpush.msra.mxu2 %v451_v39  ;;  %513 = vmatpush.msra.mxu3 %v468_v56 }
  0x7a   :  { %495 = vmatpush.msra.mxu2 %v450_v29  ;;  %514 = vmatpush.msra.mxu3 %v467_v58 }
  0x7c   :  { %496 = vmatpush.msra.mxu2 %v449_v41  ;;  %515 = vmatpush.msra.mxu3 %v466_v61 }
  0x7e   :  { %497 = vmatpush.msra.mxu2 %v448_v43  ;;  %516 = vmatpush.msra.mxu3 %v465_v63 }
  0x80   :  { %498 = vmatpush.msra.mxu2 %v447_v45  ;;  %517 = vmatpush.msra.mxu3 %v464_v2 }
  0x82   :  { %518 = vmatpush.msra.mxu3 %v463_v4 }
  0xc0   :  { %v262_v55 = vpop.f32.mrf.mxu0 }
  0xc1   :  { %v263_v57 = vadd.f32 %v262_v55, %v237_v53 }
  0xc4   :  { %v282_v59 = vpop.f32.mrf.mxu1  ;;  %v302_v60 = vpop.f32.mrf.mxu2 }
  0xc5   :  { %v283_v62 = vadd.f32 %v282_v59, %v263_v57 }
  0xc7   :  { %v303_v0 = vadd.f32 %v302_v60, %v283_v62 }
  0xc8   :  { %v322_v1 = vpop.f32.mrf.mxu3 }
  0xc9   :  { %v323_v3 = vadd.f32 %v322_v1, %v303_v0 }
  0xcc   :  { %v342_v5 = vpop.f32.mrf.mxu0 }
  0xcd   :  { %v343_v6 = vadd.f32 %v342_v5, %v323_v3 }
  0xcf   :  { %v445_v7 = vmax.f32 %v343_v6, 0.0 }
  0xd1   :  { %499 = vmatmul.f32.vlgmr.msra.gmra.mxu2 %v445_v7 }
  0xdc   :  { %v362_v9 = vpop.f32.mrf.mxu1 }
  0xdd   :  { %v363_v10 = vadd.f32 %v362_v9, %v238_v8 }
  0xe0   :  { %v382_v11 = vpop.f32.mrf.mxu2 }
  0xe1   :  { %v383_v12 = vadd.f32 %v382_v11, %v363_v10 }
  0xe4   :  { %v402_v13 = vpop.f32.mrf.mxu3 }
  0xe5   :  { %v403_v14 = vadd.f32 %v402_v13, %v383_v12 }
  0xe8   :  { %v422_v15 = vpop.f32.mrf.mxu0  ;;  %v442_v17 = vpop.f32.mrf.mxu1 }
  0xe9   :  { %v423_v16 = vadd.f32 %v422_v15, %v403_v14 }
  0xeb   :  { %v443_v18 = vadd.f32 %v442_v17, %v423_v16 }
  0xed   :  { %v446_v19 = vmax.f32 %v443_v18, 0.0 }
  0xef   :  { %519 = vmatmul.f32.vlgmr.msra.gmra.mxu3 %v446_v19 }
 0x154   :  { %v500_v22 = vpop.f32.mrf.mxu2 }
 0x155   :  { %v501_v23 = vadd.f32 %v554_v20, %v500_v22 }
 0x172   :  { %v520_v24 = vpop.f32.mrf.mxu3 }
 0x173   :  { %v521_v25 = vadd.f32 %v520_v24, %v501_v23 }
 0x175   :  { %523 = vst [vmem:[#allocation10] sm:$0xff] %v521_v25 }
 0x176   :  { %534 = dma.vmem_to_hbm [thread:$0]  %s530_s16, 128, %s532_s19, [#allocation4]  }
 0x177   :  { %681 = dma.done.wait [#allocation4], 128  }
 0x178   :  { %682 = vsyncadd [#allocation4], 4294967168 }
 0x179   :  { %539 = vsyncpa [#allocation3], 1 }
 0x17a   :  { %540 = vsyncpa [#allocation6], 1 }
 0x17b   :  { %541 = vsyncpa [#allocation9], 1 }
 0x17c   :  { %542 = vsyncpa [#allocation4], 1 }

</bundles_post_ra>
